<compile_context>
chip_gen: v7x
topology: tpu7x:2x2x1
jax: 0.10.0
libtpu: 0.0.40
codegen_flags: <defaults>
</compile_context>

<pallas_src>
import jax
import jax.numpy as jnp
from jax import lax
from jax.experimental import pallas as pl
from jax.experimental.pallas import tpu as pltpu


# ---------------------------------------------------------------------------
# VMEM capacity query (per-generation: 128 MiB on v5e/v6e, 64 MiB on v7x).
# ---------------------------------------------------------------------------
def _vmem_capacity_bytes():
    try:
        info = pltpu.get_tpu_info()
        cap = getattr(info, "vmem_capacity_bytes", None)
        if cap:
            return int(cap)
    except Exception:
        pass
    return 64 * 1024 * 1024  # conservative fallback (v7x-sized)


# ---------------------------------------------------------------------------
# Fused path: whole problem VMEM-resident, single invocation (no grid, so no
# double-buffering of inputs).  P is read from HBM exactly once.
# ---------------------------------------------------------------------------
def _fused_kernel(x_ref, p_ref, b_ref, o_ref):
    xc = x_ref[...] - b_ref[...]                                   # (B, D)
    # h = (x - b) @ P^T without materializing a transpose of P:
    # contract last dim of xc with last dim of P -> (B, Hd).
    h = lax.dot_general(
        xc, p_ref[...],
        dimension_numbers=(((1,), (1,)), ((), ())),
        preferred_element_type=jnp.float32)
    out = jnp.dot(h, p_ref[...], preferred_element_type=jnp.float32) + b_ref[...]
    o_ref[...] = out.astype(o_ref.dtype)


# ---------------------------------------------------------------------------
# Streamed path (large D): single call, grid = (phase, tile).
#   phase 0: accumulate h = (x - b) @ P^T into VMEM scratch over k-tiles.
#   phase 1: out_j = h @ P_j + b_j per j-tile, written from the scratch.
# Output block index is (0, 0) throughout phase 0 (resident, never written
# back) and (0, t) in phase 1, so every HBM output block is written exactly
# once, after valid data has been stored.
# ---------------------------------------------------------------------------
def _streamed_kernel(x_ref, p_ref, b_ref, o_ref, h_ref):
    phase = pl.program_id(0)
    t = pl.program_id(1)

    @pl.when((phase == 0) & (t == 0))
    def _():
        h_ref[...] = jnp.zeros_like(h_ref)

    @pl.when(phase == 0)
    def _():
        xc = x_ref[...] - b_ref[...]                               # (B, tile)
        h_ref[...] += lax.dot_general(
            xc, p_ref[...],
            dimension_numbers=(((1,), (1,)), ((), ())),
            preferred_element_type=jnp.float32)                    # (B, Hd)

    @pl.when(phase == 1)
    def _():
        out = jnp.dot(h_ref[...], p_ref[...],
                      preferred_element_type=jnp.float32) + b_ref[...]
        o_ref[...] = out.astype(o_ref.dtype)


def _pick_tile(D, Hd, B, budget_bytes):
    """Largest multiple of 128 that divides D and fits the VMEM budget."""
    # Double-buffered per-step tiles: P (Hd), x (B), out (B), bias (1) columns.
    per_col_bytes = 2 * 4 * (Hd + 2 * B + 1)
    cap = max(128, budget_bytes // max(per_col_bytes, 1))
    cap = min(cap, D, 16384)
    cap = (cap // 128) * 128
    t = cap
    while t >= 128:
        if D % t == 0:
            return t
        t -= 128
    return 128  # unreachable when D % 128 == 0


def affine_self_adjoint_denoiser(x, projection, bias, *, tile=None,
                                 force_streamed=False):
    """x: (B, 3, H, W) f32; projection: (hidden, D); bias: (D,)."""
    B = x.shape[0]
    Hd, D = projection.shape

    x_flat = x.reshape(B, D)
    b2 = bias.reshape(1, D)

    cap = _vmem_capacity_bytes()
    budget = int(0.70 * cap)          # resident-path budget
    vmem_limit = int(0.75 * cap)      # scoped VMEM limit handed to Mosaic

    # Single-buffer f32 footprint of the fused path:
    #   P + x + xc + out-temp (3*B*D) + bias + bias-broadcast slack + h.
    fused_bytes = 4 * (Hd * D + 3 * B * D + 2 * D + B * Hd)

    can_stream = (D % 128 == 0)
    use_fused = (fused_bytes <= budget and not force_streamed) or not can_stream

    if use_fused:
        # -------- single invocation, everything VMEM-resident, P read once ----
        out_flat = pl.pallas_call(
            _fused_kernel,
            out_shape=jax.ShapeDtypeStruct((B, D), x.dtype),
            compiler_params=pltpu.CompilerParams(
                vmem_limit_bytes=vmem_limit),
        )(x_flat, projection, b2)
        return out_flat.reshape(x.shape)

    # -------- large-D streamed path: one call, h lives in VMEM scratch --------
    if tile is None:
        tile = _pick_tile(D, Hd, B, budget)
    else:
        assert tile % 128 == 0 and D % tile == 0, \
            "tile must be a multiple of 128 that divides D"
    num_t = D // tile

    grid_spec = pltpu.PrefetchScalarGridSpec(
        num_scalar_prefetch=0,
        grid=(2, num_t),                                   # (phase, tile)
        in_specs=[
            # x: only needed in phase 0; pin to block 0 during phase 1 so it
            # is not re-streamed.
            pl.BlockSpec((B, tile), lambda p, t: (0, t * (1 - p))),
            # P: k-tiles in phase 0, j-tiles in phase 1 (read twice total).
            pl.BlockSpec((Hd, tile), lambda p, t: (0, t)),
            # bias: subtracted per k-tile (phase 0), added per j-tile (phase 1).
            pl.BlockSpec((1, tile), lambda p, t: (0, t)),
        ],
        # Phase 0: constant block (0,0), stays resident, never written back.
        # Phase 1: block (0,t), written once then flushed.
        out_specs=pl.BlockSpec((B, tile), lambda p, t: (0, t * p)),
        scratch_shapes=[pltpu.VMEM((B, Hd), jnp.float32)],
    )

    out_flat = pl.pallas_call(
        _streamed_kernel,
        out_shape=jax.ShapeDtypeStruct((B, D), x.dtype),
        grid_spec=grid_spec,
        compiler_params=pltpu.CompilerParams(
            dimension_semantics=("arbitrary", "arbitrary"),
            vmem_limit_bytes=vmem_limit),
    )(x_flat, projection, b2)
    return out_flat.reshape(x.shape)


if __name__ == "__main__":
    key = jax.random.PRNGKey(0)
    k_x, k_p, k_b = jax.random.split(key, 3)

    # Module config (small): input_hw=16 -> D = 3*16*16 = 768, hidden=32
    input_hw = 16
    hidden_dim = 32
    init_std = 0.02
    B = 2
    D = 3 * input_hw ** 2

    x = jax.random.normal(k_x, (B, 3, input_hw, input_hw), dtype=jnp.float32)
    projection = init_std * jax.random.normal(k_p, (hidden_dim, D), dtype=jnp.float32)
    # __init__ sets bias to zeros; use a small deterministic nonzero bias here
    # so the bias path of the kernel is actually exercised.
    bias = 0.1 * jax.random.normal(k_b, (D,), dtype=jnp.float32)

    # Pure-JAX reference of the PyTorch forward.
    x_flat = x.reshape(B, D)
    h_ref = x_flat @ projection.T + (-(projection @ bias))
    ref = (h_ref @ projection + bias).reshape(B, 3, input_hw, input_hw)

    # Fused single-invocation path (the one used at the shipped problem size).
    out = affine_self_adjoint_denoiser(x, projection, bias)
    out = jax.block_until_ready(out)
    assert out.shape == (B, 3, input_hw, input_hw)
    assert jnp.allclose(out, ref, atol=1e-5, rtol=1e-5)

    # Also exercise the large-D streamed path (single call, h in VMEM scratch).
    out_streamed = affine_self_adjoint_denoiser(
        x, projection, bias, tile=256, force_streamed=True)
    out_streamed = jax.block_until_ready(out_streamed)
    assert jnp.allclose(out_streamed, ref, atol=1e-5, rtol=1e-5)

    print("KERNEL_OK")
</pallas_src>

<mosaic_0001>
module attributes {stable_mosaic.version = 11 : i64} {
  func.func @_fused_kernel(%arg0: memref<2x768xf32, #tpu.memory_space<vmem>>, %arg1: memref<32x768xf32, #tpu.memory_space<vmem>>, %arg2: memref<1x768xf32, #tpu.memory_space<vmem>>, %arg3: memref<2x768xf32, #tpu.memory_space<vmem>>) attributes {dimension_semantics = [], scalar_prefetch = 0 : i64, scratch_operands = 0 : i64, tpu.core_type = #tpu.core_type<tc>} {
    %c0 = arith.constant 0 : index
    %c0_0 = arith.constant 0 : index
    %0 = vector.load %arg0[%c0, %c0_0] : memref<2x768xf32, #tpu.memory_space<vmem>>, vector<2x768xf32>
    %c0_1 = arith.constant 0 : index
    %c0_2 = arith.constant 0 : index
    %1 = vector.load %arg2[%c0_1, %c0_2] : memref<1x768xf32, #tpu.memory_space<vmem>>, vector<1x768xf32>
    %2 = vector.broadcast %1 : vector<1x768xf32> to vector<2x768xf32>
    %3 = arith.subf %0, %2 : vector<2x768xf32>
    %c0_3 = arith.constant 0 : index
    %c0_4 = arith.constant 0 : index
    %4 = vector.load %arg1[%c0_3, %c0_4] : memref<32x768xf32, #tpu.memory_space<vmem>>, vector<32x768xf32>
    %cst = arith.constant dense<0.000000e+00> : vector<2x32xf32>
    %5 = tpu.matmul %3, %4, %cst {dimension_numbers = #tpu.dot_dimension_numbers<[1], [1], [0], [0], [0, 0, 1, 0], [], []>} : vector<2x768xf32>, vector<32x768xf32>, vector<2x32xf32> -> vector<2x32xf32>
    %c0_5 = arith.constant 0 : index
    %c0_6 = arith.constant 0 : index
    %6 = vector.load %arg1[%c0_5, %c0_6] : memref<32x768xf32, #tpu.memory_space<vmem>>, vector<32x768xf32>
    %cst_7 = arith.constant dense<0.000000e+00> : vector<2x768xf32>
    %7 = tpu.matmul %5, %6, %cst_7 {dimension_numbers = #tpu.dot_dimension_numbers<[1], [0], [0], [1], [0, 0, 1, 1], [], []>} : vector<2x32xf32>, vector<32x768xf32>, vector<2x768xf32> -> vector<2x768xf32>
    %c0_8 = arith.constant 0 : index
    %c0_9 = arith.constant 0 : index
    %8 = vector.load %arg2[%c0_8, %c0_9] : memref<1x768xf32, #tpu.memory_space<vmem>>, vector<1x768xf32>
    %9 = vector.broadcast %8 : vector<1x768xf32> to vector<2x768xf32>
    %10 = arith.addf %7, %9 : vector<2x768xf32>
    %c0_10 = arith.constant 0 : index
    %c0_11 = arith.constant 0 : index
    %11 = vector.load %arg3[%c0_10, %c0_11] : memref<2x768xf32, #tpu.memory_space<vmem>>, vector<2x768xf32>
    tpu.vector_store %arg3[%c0_10, %c0_11], %10 {strides = array<i32>} : memref<2x768xf32, #tpu.memory_space<vmem>>, vector<2x768xf32>,
    return
  }
}

</mosaic_0001>

<bundles_post_ra>
// kernel: tpu_custom_call.1
= control target key start
LH: loop header
LB: loop body
LE: loop exit
PB: predicated region body
PF: predicated region fallthrough
CT: control target
= control target key end

     0   :  { %8 = vsyncpa [#allocation3], 0  ;;  %s892_s0 = inlined_call_operand.hbm [shape: f32[2,768], index: 0, kind: input, shape index: {}]   ;;  %s893_s1 = inlined_call_operand.hbm [shape: f32[32,768], index: 1, kind: input, shape index: {}]   ;;  %s894_s2 = inlined_call_operand.vmem [shape: f32[1,768], index: 2, kind: input, shape index: {}]   ;;  %s895_s3 = inlined_call_operand.hbm [shape: f32[2,768], index: 3, kind: output, shape index: {}]  }
   0x1   :  { %9 = vsyncpa [#allocation6], 0 }
   0x2   :  { %10 = vsyncpa [#allocation4], 0  ;;  %s773_s12 = smov [#allocation2]   ;;  %s774_s14 = smov [#allocation5]  }
   0x3   :  { %s17_s13 = sshll.u32 %s773_s12, 4  ;;  %s26_s15 = sshll.u32 %s774_s14, 4  ;;  %s18_s13 = int_to_ptr.vmem [resolvable:$true] %s17_s13  ;;  %s800_s15 = int_to_ptr.vmem [resolvable:$true] %s26_s15 }
   0x4   :  { %s701_s18 = scalar_lea.hbm %s892_s0, 192 }
   0x5   :  { %p702_p0 = scmp.ne.s32.totalorder %s892_s0, %s701_s18  ;;  %p705_p1 = scmp.lt.u32.totalorder %s701_s18, %s892_s0 }
   0x7   :  { %p707_p2 = pnand %p705_p1, %p702_p0 }
   0x9   :  { %710 = shalt.err (!%p707_p2)
}
   0xa   :  { %s711_s23 = scalar_lea.vmem %s18_s13, 192  ;;  %p716_p4 = scmp.lt.s32.totalorder %s18_s13, %s18_s13 }
   0xb   :  { %p712_p3 = scmp.ne.s32.totalorder %s18_s13, %s711_s23  ;;  %p717_p5 = scmp.lt.s32.totalorder %s711_s23, %s711_s23 }
   0xd   :  { %p718_p6 = por %p717_p5, %p716_p4 }
   0xf   :  { %p719_p7 = pnand %p718_p6, %p712_p3 }
  0x11   :  { %722 = shalt.err (!%p719_p7)
}
  0x12   :  { %20 = dma.hbm_to_vmem [thread:$0]  %s892_s0, 192, %s18_s13, [#allocation3]  }
  0x13   :  { %s723_s28 = scalar_lea.hbm %s893_s1, 3072 }
  0x14   :  { %p724_p8 = scmp.ne.s32.totalorder %s893_s1, %s723_s28  ;;  %p727_p9 = scmp.lt.u32.totalorder %s723_s28, %s893_s1 }
  0x16   :  { %p729_p10 = pnand %p727_p9, %p724_p8 }
  0x18   :  { %732 = shalt.err (!%p729_p10)
}
  0x19   :  { %s733_s6 = scalar_lea.vmem %s800_s15, 3072  ;;  %p738_p12 = scmp.lt.s32.totalorder %s800_s15, %s800_s15 }
  0x1a   :  { %p734_p11 = scmp.ne.s32.totalorder %s800_s15, %s733_s6  ;;  %p739_p13 = scmp.lt.s32.totalorder %s733_s6, %s733_s6 }
  0x1c   :  { %p740_p0 = por %p739_p13, %p738_p12 }
  0x1e   :  { %p741_p1 = pnand %p740_p0, %p734_p11 }
  0x20   :  { %744 = shalt.err (!%p741_p1)
}
  0x21   :  { %s775_s0 = smov 768   ;;  %s776_s7 = smov 48  }
  0x22   :  { %32 = dma.hbm_to_vmem [thread:$0]  %s893_s1, 3072, %s800_s15, [#allocation6], %s775_s0, %s775_s0, %s776_s7  }
  0x23   :  { %767 = dma.done.wait [#allocation3], 192  }
  0x24   :  { %768 = vsyncadd [#allocation3], 4294967104 }
  0x25   :  { %769 = dma.done.wait [#allocation6], 3072  }
  0x26   :  { %770 = vsyncadd [#allocation6], 4294964224  ;;  %v45_v0 = vlaneseq  ;;  %v777_v2 = vmov 1983009808   ;;  %v107_v4 = vld [vmem:[#allocation5 + $0x18] sm:$0xff]  ;;  %v113_v5 = vld [vmem:[#allocation5 + $0x48] sm:$0xff] }
  0x27   :  { %v78_v3 = vunpack.c.l.s4 %v777_v2  ;;  %v106_v6 = vld [vmem:[#allocation5 + $0x10] sm:$0xff]  ;;  %v831_v9 = vpack.c.bf16 %v113_v5, %v107_v4  ;;  %v112_v10 = vld [vmem:[#allocation5 + $0x40] sm:$0xff]  ;;  %v119_v11 = vld [vmem:[#allocation5 + $0x78] sm:$0xff]  ;;  %vm371_vm0 = vcmask 261120  }
  0x28   :  { %v46_v1 = vshrl.u32 %v45_v0, 7  ;;  %v125_v12 = vld [vmem:[#allocation5 + $0xa8] sm:$0xff]  ;;  %v833_v16 = vpack.c.bf16 %v112_v10, %v106_v6  ;;  %v111_v21 = vld [vmem:[#allocation5 + $0x38] sm:$0xff]  ;;  %v104_v22 = vld [vmem:[#allocation5] sm:$0xff]  ;;  %v778_v10 = vmov 0.0  }
  0x29   :  { %v79_v8 = vunpack.c.0.s8 %v78_v3  ;;  %v835_v17 = vpack.c.bf16 %v125_v12, %v119_v11  ;;  %v105_v18 = vld [vmem:[#allocation5 + $0x8] sm:$0xff]  ;;  %652 = vmatprep.subr.bf16.mxu0 %v831_v9  ;;  %v110_v23 = vld [vmem:[#allocation5 + $0x30] sm:$0xff]  ;;  %v124_v29 = vld [vmem:[#allocation5 + $0xa0] sm:$0xff] }
  0x2a   :  { %v47_v7 = vsub.s32 0, %v46_v1  ;;  %v51_v13 = vsub.s32 1, %v46_v1  ;;  %v55_v14 = vsub.s32 2, %v46_v1  ;;  %v59_v15 = vsub.s32 3, %v46_v1  ;;  %654 = vmatpush1.bf16.xpose.msra.mxu0 %v833_v16  ;;  %v43_v26 = vld [vmem:[%s894_s2] sm:$0x3f] }
  0x2b   :  { %v63_v19 = vsub.s32 4, %v46_v1  ;;  %v67_v20 = vsub.s32 5, %v46_v1  ;;  %v643_v24 = vpack.c.bf16 %v111_v21, %v105_v18  ;;  %v645_v25 = vpack.c.bf16 %v110_v23, %v104_v22  ;;  %656 = vmatprep.subr.bf16.mxu0 %v835_v17  ;;  %v118_v28 = vld [vmem:[#allocation5 + $0x70] sm:$0xff]  ;;  %v109_v34 = vld [vmem:[#allocation5 + $0x28] sm:$0xff]  ;;  %v115_v35 = vld [vmem:[#allocation5 + $0x58] sm:$0xff]  ;;  %s779_s2 = smov [#allocation7]  }
  0x2c   :  { %v842_v27 = vsub.s32 %v79_v8, %v46_v1  ;;  %v845_v30 = vrot.slane %v43_v26, %v47_v7  ;;  %v847_v31 = vrot.slane %v43_v26, %v51_v13  ;;  %v849_v32 = vrot.slane %v43_v26, %v55_v14  ;;  %v117_v36 = vld [vmem:[#allocation5 + $0x68] sm:$0xff]  ;;  %v123_v37 = vld [vmem:[#allocation5 + $0x98] sm:$0xff]  ;;  %v116_v44 = vld [vmem:[#allocation5 + $0x60] sm:$0xff]  ;;  %s629_s11 = sshll.u32 %s779_s2, 4  ;;  %s630_s11 = int_to_ptr.vmem [resolvable:$true] %s629_s11 }
  0x2d   :  { %v851_v33 = vrot.slane %v43_v26, %v59_v15  ;;  %644 = vmatprep.subr.bf16.mxu1 %v643_v24  ;;  %v853_v38 = vrot.slane %v43_v26, %v63_v19  ;;  %v855_v39 = vrot.slane %v43_v26, %v67_v20  ;;  %v647_v42 = vpack.c.bf16 %v123_v37, %v117_v36  ;;  %v122_v45 = vld [vmem:[#allocation5 + $0x90] sm:$0xff]  ;;  %v42_v50 = vld [vmem:[#allocation2 + $0x8] sm:$0xf]  ;;  %v108_v60 = vld [vmem:[#allocation5 + $0x20] sm:$0xff]  ;;  %s745_s12 = scalar_lea.vmem %s630_s11, 192  ;;  %p750_p3 = scmp.lt.s32.totalorder %s630_s11, %s630_s11 }
  0x2e   :  { %646 = vmatpush1.bf16.xpose.msra.mxu1 %v645_v25  ;;  %v75_v40 = vcombine.low %v845_v30, %v847_v31  ;;  %v657_v43 = vpack.c.bf16 %v124_v29, %v118_v28  ;;  %v659_v49 = vpack.c.bf16 %v115_v35, %v109_v34  ;;  %v41_v51 = vld [vmem:[#allocation2] sm:$0xff]  ;;  %v649_v54 = vpack.c.bf16 %v122_v45, %v116_v44  ;;  %v121_v63 = vld [vmem:[#allocation5 + $0x88] sm:$0xff]  ;;  %v120_v6 = vld [vmem:[#allocation5 + $0x80] sm:$0xff]  ;;  %p746_p2 = scmp.ne.s32.totalorder %s630_s11, %s745_s12  ;;  %p751_p4 = scmp.lt.s32.totalorder %s745_s12, %s745_s12 }
  0x2f   :  { %v76_v41 = vcombine.low %v849_v32, %v851_v33  ;;  %v92_v46 = vcombine.low %v853_v38, %v855_v39  ;;  %648 = vmatprep.subr.bf16.mxu1 %v647_v42  ;;  %v114_v61 = vld [vmem:[#allocation5 + $0x50] sm:$0xff]  ;;  %v127_v0 = vld [vmem:[#allocation5 + $0xb8] sm:$0xff] }
  0x30   :  { %v83_v47 = vrot.slane %v75_v40, %v842_v27  ;;  %v661_v3 = vpack.c.bf16 %v114_v61, %v108_v60  ;;  %v663_v5 = vpack.c.bf16 %v127_v0, %v121_v63  ;;  %v126_v7 = vld [vmem:[#allocation5 + $0xb0] sm:$0xff]  ;;  %p752_p5 = por %p751_p4, %p750_p3 }
  0x31   :  { %v90_v48 = vrot.slane %v76_v41, %v842_v27  ;;  %v99_v52 = vrot.slane %v92_v46, %v842_v27  ;;  %v665_v8 = vpack.c.bf16 %v126_v7, %v120_v6 }
  0x32   :  { %658 = vmatpush1.bf16.xpose.msra.mxu0 %v657_v43  ;;  %p753_p6 = pnand %p752_p5, %p746_p2 }
  0x33   :  { %v91_v53 = vcombine.low %v83_v47, %v90_v48  ;;  %v103_v55 = vsub.f32 %v42_v50, %v99_v52  ;;  %660 = vmatprep.subr.bf16.mxu0 %v659_v49 }
  0x35   :  { %v102_v56 = vsub.f32 %v41_v51, %v91_v53  ;;  %v153_v59 = vrot.slane %v103_v55, %v842_v27 }
  0x36   :  { %650 = vmatpush1.bf16.xpose.msra.mxu1 %v649_v54 }
  0x37   :  { %v130_v57 = vcombine.high %v102_v56, %v102_v56  ;;  %v137_v58 = vrot.slane %v102_v56, %v842_v27  ;;  %668 = vmatprep.subr.bf16.mxu1 %v643_v24  ;;  %v154_v4 = vcombine.high %v153_v59, %v153_v59 }
  0x39   :  { %v144_v62 = vrot.slane %v130_v57, %v842_v27  ;;  %v145_v1 = vcombine.high %v137_v58, %v137_v58 }
  0x3b   :  { %v146_v2 = vcombine.high %v144_v62, %v144_v62  ;;  %225 = vmatprep.mubr.f32.mxu1 %v145_v1 }
  0x3d   :  { %295 = vmatprep.mubr.f32.mxu0 %v146_v2  ;;  %226 = vmatmul.mubr.f32.vlgmr.msra.gmra.mrb[0].mxu1 %v137_v58 }
  0x3e   :  { %296 = vmatmul.mubr.f32.vlgmr.msra.gmra.mrb[0].mxu0 %v144_v62  ;;  %670 = vmatpush1.bf16.msra.mxu1 %v645_v25 }
  0x3f   :  { %662 = vmatpush1.bf16.xpose.msra.mxu0 %v661_v3  ;;  %365 = vmatprep.mubr.f32.mxu0 %v154_v4 }
  0x40   :  { %664 = vmatprep.subr.bf16.mxu0 %v663_v5  ;;  %672 = vmatprep.subr.bf16.mxu1 %v647_v42 }
  0x41   :  { %439 = vmatprep.mubr.f32.mxu1 %v778_v10 }
  0x42   :  { %674 = vmatpush1.bf16.msra.mxu1 %v649_v54 }
  0x43   :  { %676 = vmatprep.subr.bf16.mxu1 %v831_v9 }
  0x47   :  { %666 = vmatpush1.bf16.xpose.msra.mxu0 %v665_v8 }
  0x4e   :  { %366 = vmatmul.mubr.f32.vlgmr.msra.gmra.mrb[0].mxu0 %v153_v59 }
 0x110   :  { %v227_v11 = vpop.f32.mrb[0].mxu1 }
 0x111   :  { %v229_v12 = vpop.f32.mrb[1].mxu1 }
 0x121   :  { %v367_v13 = vpop.f32.mrb[0].mxu0 }
 0x122   :  { %v691_v14 = vadd.f32 %v367_v13, %v227_v11  ;;  %v369_v15 = vpop.f32.mrb[1].mxu0 }
 0x124   :  { %639 = vmatmul.mubr.msk.f32.vlgmr.msra.gmra.mrb[2].mxu1 %vm371_vm0, %v691_v14 }
 0x125   :  { %678 = vmatpush1.bf16.msra.mxu1 %v833_v16  ;;  %510 = vmatprep.mubr.f32.mxu1 %v778_v10 }
 0x126   :  { %680 = vmatprep.subr.bf16.mxu1 %v835_v17 }
 0x129   :  { %682 = vmatpush1.bf16.msra.mxu1 %v657_v43 }
 0x12a   :  { %684 = vmatprep.subr.bf16.mxu1 %v659_v49 }
 0x12c   :  { %640 = vmatmul.mubr.msk.f32.vlgmr.msra.gmra.mrb[4].mxu1 %vm371_vm0, %v691_v14 }
 0x12d   :  { %686 = vmatpush1.bf16.msra.mxu1 %v661_v3  ;;  %581 = vmatprep.mubr.f32.mxu1 %v778_v10 }
 0x12e   :  { %688 = vmatprep.subr.bf16.mxu1 %v663_v5 }
 0x131   :  { %690 = vmatpush1.bf16.msra.mxu1 %v665_v8 }
 0x134   :  { %641 = vmatmul.mubr.msk.f32.vlgmr.msra.gmra.mrb[6].mxu1 %vm371_vm0, %v691_v14 }
 0x1f7   :  { %v441_v9 = vpop.f32.mrb[2].mxu1 }
 0x1f8   :  { %v442_v18 = vadd.f32 %v441_v9, %v845_v30  ;;  %v443_v19 = vpop.f32.mrb[3].mxu1 }
 0x1f9   :  { %v444_v20 = vadd.f32 %v443_v19, %v847_v31 }
 0x1fb   :  { %v594_v21 = vcombine.low %v442_v18, %v444_v20 }
 0x1fd   :  { %v602_v25 = vrot.slane %v594_v21, %v842_v27 }
 0x1ff   :  { %v512_v22 = vpop.f32.mrb[4].mxu1 }
 0x200   :  { %v513_v16 = vadd.f32 %v512_v22, %v849_v32  ;;  %v514_v23 = vpop.f32.mrb[5].mxu1 }
 0x201   :  { %v515_v17 = vadd.f32 %v514_v23, %v851_v33 }
 0x203   :  { %v595_v24 = vcombine.low %v513_v16, %v515_v17 }
 0x205   :  { %v609_v26 = vrot.slane %v595_v24, %v842_v27 }
 0x207   :  { %v583_v28 = vpop.f32.mrb[6].mxu1  ;;  %v610_v29 = vcombine.low %v602_v25, %v609_v26 }
 0x208   :  { %v584_v34 = vadd.f32 %v583_v28, %v853_v38  ;;  %v585_v30 = vpop.f32.mrb[7].mxu1 }
 0x209   :  { %v586_v31 = vadd.f32 %v585_v30, %v855_v39  ;;  %621 = vst [vmem:[#allocation7] sm:$0xff] %v610_v29 }
 0x20b   :  { %v611_v35 = vcombine.low %v584_v34, %v586_v31 }
 0x20d   :  { %642 = vst.sshfl [vmem:[#allocation7 + $0x8] sm:$0x33 pattern:$0x76325410] %v611_v35 }
 0x20e   :  { %756 = shalt.err (!%p753_p6)
}
 0x20f   :  { %s757_s15 = scalar_lea.hbm %s895_s3, 192 }
 0x210   :  { %p758_p7 = scmp.ne.s32.totalorder %s895_s3, %s757_s15  ;;  %p761_p8 = scmp.lt.u32.totalorder %s757_s15, %s895_s3 }
 0x212   :  { %p763_p9 = pnand %p761_p8, %p758_p7 }
 0x214   :  { %766 = shalt.err (!%p763_p9)
}
 0x215   :  { %632 = dma.vmem_to_hbm [thread:$0]  %s630_s11, 192, %s895_s3, [#allocation4]  }
 0x216   :  { %771 = dma.done.wait [#allocation4], 192  }
 0x217   :  { %772 = vsyncadd [#allocation4], 4294967104 }
 0x218   :  { %636 = vsyncpa [#allocation3], 1 }
 0x219   :  { %637 = vsyncpa [#allocation6], 1 }
 0x21a   :  { %638 = vsyncpa [#allocation4], 1 }

</bundles_post_ra>
